<compile_context>
chip_gen: v7x
topology: tpu7x:2x2x1
jax: 0.10.0
libtpu: 0.0.40
codegen_flags: <defaults>
</compile_context>

<pallas_src>
import functools
import math

import jax
import jax.numpy as jnp
import numpy as np
from jax.experimental import pallas as pl
from jax.experimental.pallas import tpu as pltpu


def _round_up(x, m):
    return ((x + m - 1) // m) * m


def mha_kernel(eq_ref, ekv_ref, wq_ref, wk_ref, wv_ref, wo_ref, o_ref,
               *, num_heads, d_head_pad, scale, seq_len, seq_pad):
    eq = eq_ref[0]      # (TQ, Dp)  bf16 — query rows for this tile
    ekv = ekv_ref[0]    # (Sp, Dp)  bf16 — full sequence for keys/values

    # Fused projections (H_Q already folded into the weights on the host):
    # only 3 D x D matmuls instead of 6.
    q = jnp.dot(eq, wq_ref[...], preferred_element_type=jnp.float32)    # (TQ, H*dhp)
    k = jnp.dot(ekv, wk_ref[...], preferred_element_type=jnp.float32)   # (Sp, H*dhp)
    v = jnp.dot(ekv, wv_ref[...], preferred_element_type=jnp.float32)   # (Sp, H*dhp)

    tq = eq.shape[0]
    sp = ekv.shape[0]
    h, dhp = num_heads, d_head_pad

    # Head-batched layout; per-head feature dim is 128-padded so the reshape
    # splits the lane dim on aligned 128-boundaries.
    qh = (q * scale).reshape(tq, h, dhp).transpose(1, 0, 2)   # (H, TQ, dhp) f32
    kh = k.reshape(sp, h, dhp).transpose(1, 0, 2)             # (H, Sp, dhp) f32
    vh = v.reshape(sp, h, dhp).transpose(1, 0, 2)             # (H, Sp, dhp) f32

    # scores = (q k^T) / sqrt(d_k) / temperature   (scale folded into q above)
    s = jnp.einsum('hqd,hkd->hqk',
                   qh.astype(jnp.bfloat16), kh.astype(jnp.bfloat16),
                   preferred_element_type=jnp.float32)        # (H, TQ, Sp) f32

    if seq_len < seq_pad:  # static: mask zero-padded key positions
        key_ids = jax.lax.broadcasted_iota(jnp.int32, s.shape, dimension=2)
        s = jnp.where(key_ids < seq_len, s, -1e9)

    # softmax in f32 (max-stabilised); reciprocal on the EUP.
    m = jnp.max(s, axis=-1, keepdims=True)
    p = jnp.exp(s - m)
    denom = jnp.sum(p, axis=-1, keepdims=True)
    w = p * pl.reciprocal(denom, approx=True)
    # TODO(synk): attention dropout (p=0.1) omitted — eval/inference semantics.

    pv = jnp.einsum('hqk,hkd->hqd',
                    w.astype(jnp.bfloat16), vh.astype(jnp.bfloat16),
                    preferred_element_type=jnp.float32)       # (H, TQ, dhp)

    # concat(heads) @ W_O.T  — single matmul, no jnp.concatenate.
    concat = pv.transpose(1, 0, 2).reshape(tq, h * dhp).astype(jnp.bfloat16)
    out = jnp.dot(concat, wo_ref[...], preferred_element_type=jnp.float32)
    o_ref[0] = out.astype(o_ref.dtype)


def multi_head_att(E, W_Q, W_K, W_V, H_Q, W_O, *, num_heads, temperature=1.0):
    """E: (B, S, D). Weights are PyTorch-style (out, in) = (D, D)."""
    B, S, D = E.shape
    assert D % num_heads == 0
    H = num_heads
    d_qkv = D // H

    # ---- Host-side weight fusion in f32:  H_Q(W(x)) == x @ (W.T @ H_Q.T) ----
    wq_f = (W_Q.T @ H_Q.T).astype(jnp.float32)
    wk_f = (W_K.T @ H_Q.T).astype(jnp.float32)   # module uses H_Q for K too
    wv_f = (W_V.T @ H_Q.T).astype(jnp.float32)   # ... and for V
    wo_t = W_O.T.astype(jnp.float32)

    # ---- Lane-dense padding: model dim and per-head dim to 128 multiples ----
    Dp = _round_up(D, 128)
    dhp = _round_up(d_qkv, 128)
    TQ = min(256, _round_up(S, 8))
    Sp = _round_up(S, TQ)

    def pad_proj(w):                     # (D, H*d_qkv) -> (Dp, H*dhp)
        w3 = w.reshape(D, H, d_qkv)
        out = jnp.zeros((Dp, H, dhp), jnp.float32)
        return out.at[:D, :, :d_qkv].set(w3).reshape(Dp, H * dhp)

    def pad_wo(w):                       # (H*d_qkv, D) -> (H*dhp, Dp)
        w3 = w.reshape(H, d_qkv, D)
        out = jnp.zeros((H, dhp, Dp), jnp.float32)
        return out.at[:, :d_qkv, :D].set(w3).reshape(H * dhp, Dp)

    # bf16 MXU fast path; fused weights were computed in f32 above.
    wq_p = pad_proj(wq_f).astype(jnp.bfloat16)
    wk_p = pad_proj(wk_f).astype(jnp.bfloat16)
    wv_p = pad_proj(wv_f).astype(jnp.bfloat16)
    wo_p = pad_wo(wo_t).astype(jnp.bfloat16)

    e_p = jnp.zeros((B, Sp, Dp), jnp.float32).at[:, :S, :D].set(E)
    e_p = e_p.astype(jnp.bfloat16)

    scale = 1.0 / (math.sqrt(d_qkv) * temperature)

    kernel = functools.partial(
        mha_kernel, num_heads=H, d_head_pad=dhp, scale=scale,
        seq_len=S, seq_pad=Sp)

    const = lambda b, qi: (0, 0)
    out_p = pl.pallas_call(
        kernel,
        out_shape=jax.ShapeDtypeStruct((B, Sp, Dp), jnp.float32),
        grid=(B, Sp // TQ),
        in_specs=[
            pl.BlockSpec((1, TQ, Dp), lambda b, qi: (b, qi, 0)),   # E: query tile
            pl.BlockSpec((1, Sp, Dp), lambda b, qi: (b, 0, 0)),    # E: full K/V rows
            pl.BlockSpec((Dp, H * dhp), const),                    # Wq (H_Q folded)
            pl.BlockSpec((Dp, H * dhp), const),                    # Wk (H_Q folded)
            pl.BlockSpec((Dp, H * dhp), const),                    # Wv (H_Q folded)
            pl.BlockSpec((H * dhp, Dp), const),                    # Wo
        ],
        out_specs=pl.BlockSpec((1, TQ, Dp), lambda b, qi: (b, qi, 0)),
        compiler_params=pltpu.CompilerParams(
            dimension_semantics=("parallel", "parallel"),
            vmem_limit_bytes=32 * 1024 * 1024),
    )(e_p, e_p, wq_p, wk_p, wv_p, wo_p)

    return out_p[:, :S, :D].astype(E.dtype)


def reference_mha(E, W_Q, W_K, W_V, H_Q, W_O, *, num_heads, temperature=1.0):
    """Pure-JAX f32 replica of the PyTorch forward (dropout as identity)."""
    B, S, D = E.shape
    d_qkv = D // num_heads
    Q = E @ W_Q.T
    K = E @ W_K.T
    V = E @ W_V.T
    HQ = Q @ H_Q.T
    HK = K @ H_Q.T   # module uses H_Q for K as well
    HV = V @ H_Q.T   # and for V

    def split(x):
        return x.reshape(B, S, num_heads, d_qkv).transpose(0, 2, 1, 3)

    q, k, v = split(HQ), split(HK), split(HV)
    scores = jnp.einsum('bhsd,bhtd->bhst', q, k) / math.sqrt(d_qkv)
    scores = scores / temperature
    w = jax.nn.softmax(scores, axis=-1)
    out = jnp.einsum('bhst,bhtd->bhsd', w, v)
    out = out.transpose(0, 2, 1, 3).reshape(B, S, D)
    return out @ W_O.T


if __name__ == "__main__":
    d_model = 10
    num_heads = 2
    batch, seq = 2, 8
    temperature = 1.0

    key = jax.random.PRNGKey(0)
    kE, kq, kk, kv, khq, ko = jax.random.split(key, 6)

    # Deterministic synthetic parameters (PyTorch shapes: (out, in) = (D, D)).
    bound = 1.0 / math.sqrt(d_model)
    E = jax.random.normal(kE, (batch, seq, d_model), dtype=jnp.float32)
    W_Q = jax.random.uniform(kq, (d_model, d_model), jnp.float32, -bound, bound)
    W_K = jax.random.uniform(kk, (d_model, d_model), jnp.float32, -bound, bound)
    W_V = jax.random.uniform(kv, (d_model, d_model), jnp.float32, -bound, bound)
    H_Q = jax.random.uniform(khq, (d_model, d_model), jnp.float32, -bound, bound)
    W_O = jax.random.uniform(ko, (d_model, d_model), jnp.float32, -bound, bound)

    out = multi_head_att(E, W_Q, W_K, W_V, H_Q, W_O,
                         num_heads=num_heads, temperature=temperature)
    out = jax.block_until_ready(out)

    ref = reference_mha(E, W_Q, W_K, W_V, H_Q, W_O,
                        num_heads=num_heads, temperature=temperature)
    # bf16 MXU inputs + approx reciprocal -> loosen tolerance vs f32 reference.
    np.testing.assert_allclose(np.asarray(out), np.asarray(ref),
                               rtol=2e-2, atol=2e-2)
    print("KERNEL_OK")
</pallas_src>

<mosaic_0001>
module attributes {stable_mosaic.version = 11 : i64} {
  func.func @mha_kernel(%arg0: i32, %arg1: i32, %arg2: memref<1x8x128xbf16, #tpu.memory_space<vmem>>, %arg3: memref<1x8x128xbf16, #tpu.memory_space<vmem>>, %arg4: memref<128x256xbf16, #tpu.memory_space<vmem>>, %arg5: memref<128x256xbf16, #tpu.memory_space<vmem>>, %arg6: memref<128x256xbf16, #tpu.memory_space<vmem>>, %arg7: memref<256x128xbf16, #tpu.memory_space<vmem>>, %arg8: memref<1x8x128xf32, #tpu.memory_space<vmem>>) attributes {dimension_semantics = [#tpu.dimension_semantics<parallel>, #tpu.dimension_semantics<parallel>], iteration_bounds = array<i64: 2, 1>, scalar_prefetch = 0 : i64, scratch_operands = 0 : i64, tpu.core_type = #tpu.core_type<tc>, window_params = [{transform_indices = @transform_0, window_bounds = array<i64: 1, 8, 128>}, {transform_indices = @transform_1, window_bounds = array<i64: 1, 8, 128>}, {pipeline_mode = #tpu.pipeline_mode<synchronous>, transform_indices = @transform_2, window_bounds = array<i64: 128, 256>}, {pipeline_mode = #tpu.pipeline_mode<synchronous>, transform_indices = @transform_3, window_bounds = array<i64: 128, 256>}, {pipeline_mode = #tpu.pipeline_mode<synchronous>, transform_indices = @transform_4, window_bounds = array<i64: 128, 256>}, {pipeline_mode = #tpu.pipeline_mode<synchronous>, transform_indices = @transform_5, window_bounds = array<i64: 256, 128>}, {transform_indices = @transform_6, window_bounds = array<i64: 1, 8, 128>}]} {
    %c0 = arith.constant 0 : index
    %c0_0 = arith.constant 0 : index
    %c0_1 = arith.constant 0 : index
    %0 = vector.load %arg2[%c0, %c0_0, %c0_1] : memref<1x8x128xbf16, #tpu.memory_space<vmem>>, vector<1x8x128xbf16>
    %1 = vector.shape_cast %0 : vector<1x8x128xbf16> to vector<8x128xbf16>
    %c0_2 = arith.constant 0 : index
    %c0_3 = arith.constant 0 : index
    %c0_4 = arith.constant 0 : index
    %2 = vector.load %arg3[%c0_2, %c0_3, %c0_4] : memref<1x8x128xbf16, #tpu.memory_space<vmem>>, vector<1x8x128xbf16>
    %3 = vector.shape_cast %2 : vector<1x8x128xbf16> to vector<8x128xbf16>
    %c0_5 = arith.constant 0 : index
    %c0_6 = arith.constant 0 : index
    %4 = vector.load %arg4[%c0_5, %c0_6] : memref<128x256xbf16, #tpu.memory_space<vmem>>, vector<128x256xbf16>
    %cst = arith.constant dense<0.000000e+00> : vector<8x256xf32>
    %5 = tpu.matmul %1, %4, %cst {dimension_numbers = #tpu.dot_dimension_numbers<[1], [0], [0], [1], [0, 0, 1, 1], [], []>} : vector<8x128xbf16>, vector<128x256xbf16>, vector<8x256xf32> -> vector<8x256xf32>
    %c0_7 = arith.constant 0 : index
    %c0_8 = arith.constant 0 : index
    %6 = vector.load %arg5[%c0_7, %c0_8] : memref<128x256xbf16, #tpu.memory_space<vmem>>, vector<128x256xbf16>
    %cst_9 = arith.constant dense<0.000000e+00> : vector<8x256xf32>
    %7 = tpu.matmul %3, %6, %cst_9 {dimension_numbers = #tpu.dot_dimension_numbers<[1], [0], [0], [1], [0, 0, 1, 1], [], []>} : vector<8x128xbf16>, vector<128x256xbf16>, vector<8x256xf32> -> vector<8x256xf32>
    %c0_10 = arith.constant 0 : index
    %c0_11 = arith.constant 0 : index
    %8 = vector.load %arg6[%c0_10, %c0_11] : memref<128x256xbf16, #tpu.memory_space<vmem>>, vector<128x256xbf16>
    %cst_12 = arith.constant dense<0.000000e+00> : vector<8x256xf32>
    %9 = tpu.matmul %3, %8, %cst_12 {dimension_numbers = #tpu.dot_dimension_numbers<[1], [0], [0], [1], [0, 0, 1, 1], [], []>} : vector<8x128xbf16>, vector<128x256xbf16>, vector<8x256xf32> -> vector<8x256xf32>
    %cst_13 = arith.constant 0.44721359 : f32
    %10 = vector.broadcast %cst_13 : f32 to vector<8x256xf32>
    %11 = arith.mulf %5, %10 : vector<8x256xf32>
    %12 = vector.shape_cast %11 : vector<8x256xf32> to vector<8x2x128xf32>
    %13 = tpu.transpose %12, [1, 0, 2] : vector<8x2x128xf32> -> vector<2x8x128xf32>
    %14 = vector.shape_cast %7 : vector<8x256xf32> to vector<8x2x128xf32>
    %15 = tpu.transpose %14, [1, 0, 2] : vector<8x2x128xf32> -> vector<2x8x128xf32>
    %16 = vector.shape_cast %9 : vector<8x256xf32> to vector<8x2x128xf32>
    %17 = tpu.transpose %16, [1, 0, 2] : vector<8x2x128xf32> -> vector<2x8x128xf32>
    %18 = arith.truncf %13 : vector<2x8x128xf32> to vector<2x8x128xbf16>
    %19 = arith.truncf %15 : vector<2x8x128xf32> to vector<2x8x128xbf16>
    "tpu.trace_start"() <{level = 10 : i32, message = "hqd,hkd->hqk"}> : () -> ()
    %cst_14 = arith.constant dense<0.000000e+00> : vector<2x8x8xf32>
    %20 = tpu.matmul %18, %19, %cst_14 {dimension_numbers = #tpu.dot_dimension_numbers<[2], [2], [1], [1], [0, 0, 0, 1, 1, 1], [0], [0]>} : vector<2x8x128xbf16>, vector<2x8x128xbf16>, vector<2x8x8xf32> -> vector<2x8x8xf32>
    "tpu.trace_stop"() : () -> ()
    %cst_15 = arith.constant dense<0xFF800000> : vector<2x8xf32>
    %21 = vector.multi_reduction <maximumf>, %20, %cst_15 [2] : vector<2x8x8xf32> to vector<2x8xf32>
    %22 = vector.shape_cast %21 : vector<2x8xf32> to vector<2x8x1xf32>
    %23 = vector.broadcast %22 : vector<2x8x1xf32> to vector<2x8x8xf32>
    %24 = arith.subf %20, %23 : vector<2x8x8xf32>
    %25 = math.exp %24 : vector<2x8x8xf32>
    %cst_16 = arith.constant dense<0.000000e+00> : vector<2x8xf32>
    %26 = vector.multi_reduction <add>, %25, %cst_16 [2] : vector<2x8x8xf32> to vector<2x8xf32>
    %27 = vector.shape_cast %26 : vector<2x8xf32> to vector<2x8x1xf32>
    %28 = tpu.reciprocal %27 {approx = true} : vector<2x8x1xf32> -> vector<2x8x1xf32>
    %29 = vector.broadcast %28 : vector<2x8x1xf32> to vector<2x8x8xf32>
    %30 = arith.mulf %25, %29 : vector<2x8x8xf32>
    %31 = arith.truncf %30 : vector<2x8x8xf32> to vector<2x8x8xbf16>
    %32 = arith.truncf %17 : vector<2x8x128xf32> to vector<2x8x128xbf16>
    "tpu.trace_start"() <{level = 10 : i32, message = "hqk,hkd->hqd"}> : () -> ()
    %cst_17 = arith.constant dense<0.000000e+00> : vector<2x8x128xf32>
    %33 = tpu.matmul %31, %32, %cst_17 {dimension_numbers = #tpu.dot_dimension_numbers<[2], [1], [1], [2], [0, 0, 0, 1, 1, 2], [0], [0]>} : vector<2x8x8xbf16>, vector<2x8x128xbf16>, vector<2x8x128xf32> -> vector<2x8x128xf32>
    "tpu.trace_stop"() : () -> ()
    %34 = tpu.transpose %33, [1, 0, 2] : vector<2x8x128xf32> -> vector<8x2x128xf32>
    %35 = vector.shape_cast %34 : vector<8x2x128xf32> to vector<8x256xf32>
    %36 = arith.truncf %35 : vector<8x256xf32> to vector<8x256xbf16>
    %c0_18 = arith.constant 0 : index
    %c0_19 = arith.constant 0 : index
    %37 = vector.load %arg7[%c0_18, %c0_19] : memref<256x128xbf16, #tpu.memory_space<vmem>>, vector<256x128xbf16>
    %cst_20 = arith.constant dense<0.000000e+00> : vector<8x128xf32>
    %38 = tpu.matmul %36, %37, %cst_20 {dimension_numbers = #tpu.dot_dimension_numbers<[1], [0], [0], [1], [0, 0, 1, 1], [], []>} : vector<8x256xbf16>, vector<256x128xbf16>, vector<8x128xf32> -> vector<8x128xf32>
    %c0_21 = arith.constant 0 : index
    %c0_22 = arith.constant 0 : index
    %c0_23 = arith.constant 0 : index
    %39 = vector.load %arg8[%c0_21, %c0_22, %c0_23] : memref<1x8x128xf32, #tpu.memory_space<vmem>>, vector<1x8x128xf32>
    %40 = vector.shape_cast %39 : vector<1x8x128xf32> to vector<8x128xf32>
    %41 = vector.shape_cast %38 : vector<8x128xf32> to vector<1x8x128xf32>
    tpu.vector_store %arg8[%c0_21, %c0_22, %c0_23], %41 {strides = array<i32>} : memref<1x8x128xf32, #tpu.memory_space<vmem>>, vector<1x8x128xf32>,
    return
  }
  func.func @transform_0(%arg0: i32, %arg1: i32) -> (i32, i32, i32) {
    %c0_i32 = arith.constant 0 : i32
    %c0_i32_0 = arith.constant 0 : i32
    return %arg0, %arg1, %c0_i32 : i32, i32, i32
  }
  func.func @transform_1(%arg0: i32, %arg1: i32) -> (i32, i32, i32) {
    %c0_i32 = arith.constant 0 : i32
    %c0_i32_0 = arith.constant 0 : i32
    %c0_i32_1 = arith.constant 0 : i32
    return %arg0, %c0_i32, %c0_i32_0 : i32, i32, i32
  }
  func.func @transform_2(%arg0: i32, %arg1: i32) -> (i32, i32) {
    %c0_i32 = arith.constant 0 : i32
    %c0_i32_0 = arith.constant 0 : i32
    %c0_i32_1 = arith.constant 0 : i32
    return %c0_i32, %c0_i32_0 : i32, i32
  }
  func.func @transform_3(%arg0: i32, %arg1: i32) -> (i32, i32) {
    %c0_i32 = arith.constant 0 : i32
    %c0_i32_0 = arith.constant 0 : i32
    %c0_i32_1 = arith.constant 0 : i32
    return %c0_i32, %c0_i32_0 : i32, i32
  }
  func.func @transform_4(%arg0: i32, %arg1: i32) -> (i32, i32) {
    %c0_i32 = arith.constant 0 : i32
    %c0_i32_0 = arith.constant 0 : i32
    %c0_i32_1 = arith.constant 0 : i32
    return %c0_i32, %c0_i32_0 : i32, i32
  }
  func.func @transform_5(%arg0: i32, %arg1: i32) -> (i32, i32) {
    %c0_i32 = arith.constant 0 : i32
    %c0_i32_0 = arith.constant 0 : i32
    %c0_i32_1 = arith.constant 0 : i32
    return %c0_i32, %c0_i32_0 : i32, i32
  }
  func.func @transform_6(%arg0: i32, %arg1: i32) -> (i32, i32, i32) {
    %c0_i32 = arith.constant 0 : i32
    %c0_i32_0 = arith.constant 0 : i32
    return %arg0, %arg1, %c0_i32 : i32, i32, i32
  }
}

</mosaic_0001>

<bundles_post_ra>
// kernel: tpu_custom_call.1
= control target key start
LH: loop header
LB: loop body
LE: loop exit
PB: predicated region body
PF: predicated region fallthrough
CT: control target
= control target key end

     0   :  { %s2916_s0 = inlined_call_operand.hbm [shape: bf16[2,8,128], index: 0, kind: input, shape index: {}]   ;;  %s2917_s1 = inlined_call_operand.hbm [shape: bf16[2,8,128], index: 1, kind: input, shape index: {}]   ;;  %s2918_s2 = inlined_call_operand.hbm [shape: bf16[128,256], index: 2, kind: input, shape index: {}]   ;;  %s2919_s3 = inlined_call_operand.hbm [shape: bf16[128,256], index: 3, kind: input, shape index: {}]   ;;  %s2920_s4 = inlined_call_operand.hbm [shape: bf16[128,256], index: 4, kind: input, shape index: {}]   ;;  %s2921_s5 = inlined_call_operand.hbm [shape: bf16[256,128], index: 5, kind: input, shape index: {}]   ;;  %s2922_s6 = inlined_call_operand.hbm [shape: f32[2,8,128], index: 6, kind: output, shape index: {}]  }
   0x1   :  { %2928 = sst [smem:[#allocation21_spill]] %s2918_s2 }
   0x2   :  { %2929 = sst [smem:[#allocation22_spill]] %s2919_s3 }
   0x3   :  { %2930 = sst [smem:[#allocation23_spill]] %s2920_s4 }
   0x4   :  { %2931 = sst [smem:[#allocation24_spill]] %s2921_s5 }
   0x5   :  { %11 = vsyncpa [#allocation3], 0 }
   0x6   :  { %13 = vsyncpa [#allocation3 + $0x1], 0 }
   0x7   :  { %14 = vsyncpa [#allocation6], 0 }
   0x8   :  { %16 = vsyncpa [#allocation6 + $0x1], 0 }
   0x9   :  { %17 = vsyncpa [#allocation9], 0 }
   0xa   :  { %18 = vsyncpa [#allocation12], 0 }
   0xb   :  { %19 = vsyncpa [#allocation4], 0 }
   0xc   :  { %21 = vsyncpa [#allocation4 + $0x1], 0  ;;  %s2478_s21 = smov 0   ;;  %s2480_s22 = smov 0  }
   0xd   :  { %s2482_s23 = smov 0   ;;  %s2484_s24 = smov 0  }
   0xe   :  { %s2486_s25 = smov 0   ;;  %s2488_s26 = smov 0  }
   0xf LB: > { %s2509_s27 = sadd.s32 4294967295, %s2425_s26   ;;  %p1792_p0 = scmp.ge.s32.totalorder %s2425_s26, 1  ;;  %s2425_s26 = sphi %s2488_s26, %s27_s26   ;;  %s2421_s25 = sphi %s2486_s25, %s2962_s25   ;;  %s2417_s24 = sphi %s2484_s24, %s2961_s24   ;;  %s2413_s23 = sphi %s2482_s23, %s2960_s23   ;;  %s2409_s22 = sphi %s2480_s22, %s2959_s22   ;;  %s2405_s21 = sphi %s2478_s21, %s2958_s21  }
  0x10   : > { %p2923_p1 = scmp.eq.s32.totalorder %s2509_s27, 0  ;;  %p210_p2 = scmp.lt.s32.totalorder %s2425_s26, 3 }
  0x11   : > { %s2427_s29 = smov [#allocation7]   ;;  %s2428_s8 = smov [#allocation8]  }
  0x12   : > { %p2514_p3 = pnand %p1792_p0, %p210_p2  ;;  %s222_s30 = sshll.u32 %s2427_s29, 4  ;;  %s2518_s30 = int_to_ptr.vmem [resolvable:$true] %s222_s30 }
  0x13   : > { %s235_s9 = sshll.u32 %s2428_s8, 4  ;;  %s2429_s10 = smov [#allocation10]   ;;  %s2529_s9 = int_to_ptr.vmem [resolvable:$true] %s235_s9 }
  0x14   : > { %s2932_s28 = scalar_select %p2514_p3, 1, 0 }
  0x15   : > { %p1964_p4 = pneg %p2514_p3  ;;  %s2531_s11 = sshll.u32 %s2429_s10, 4  ;;  %s249_s11 = int_to_ptr.vmem [resolvable:$true] %s2531_s11 }
  0x16   : > { %s2934_s2 = sld [smem:[#allocation21_spill]] }
  0x17   : > { %p2525_p6 = pnand %p1964_p4, %p2923_p1 }
  0x19   : > { %p2541_p8 = pneg %p2525_p6 }
  0x1c   : > { %s2155_s14 = scalar_lea.hbm %s2934_s2, 2048 }
  0x1d   : > { %p2156_p7 = scmp.ne.s32.totalorder %s2934_s2, %s2155_s14  ;;  %p2162_p11 = scmp.lt.u32.totalorder %s2155_s14, %s2934_s2 }
  0x1f   : > { %p2158_p9 = pnand %p2541_p8, %p2156_p7 }
  0x21   : > { %p2159_p10 = pneg %p2158_p9 }
  0x23   : > { %p2164_p12 = pnand %p2162_p11, %p2159_p10 }
  0x25   : > { %2167 = shalt.err (!%p2164_p12)
}
  0x26   : > { %s2168_s20 = scalar_lea.vmem %s2518_s30, 2048  ;;  %p2176_p4 = scmp.lt.s32.totalorder %s2518_s30, %s2518_s30 }
  0x27   : > { %p2169_p13 = scmp.ne.s32.totalorder %s2518_s30, %s2168_s20  ;;  %p2177_p5 = scmp.lt.s32.totalorder %s2168_s20, %s2168_s20 }
  0x29   : > { %p2171_p0 = pnand %p2169_p13, %p2541_p8  ;;  %p2178_p7 = por %p2177_p5, %p2176_p4 }
  0x2b   : > { %p2172_p2 = pneg %p2171_p0 }
  0x2d   : > { %p2179_p9 = pnand %p2178_p7, %p2172_p2 }
  0x2f   : > { %2182 = shalt.err (!%p2179_p9)
}
  0x30   : > { %s2430_s29 = smov 128   ;;  %s2431_s8 = smov 8  }
  0x31   : > { %1967 = dma.hbm_to_vmem [thread:$0]  (!%p2525_p6), %s2934_s2, 2048, %s2518_s30, [#allocation6], %s2430_s29, %s2430_s29, %s2431_s8  }
  0x32   : > { %s2936_s3 = sld [smem:[#allocation22_spill]] }
  0x38   : > { %s2183_s15 = scalar_lea.hbm %s2936_s3, 2048 }
  0x39   : > { %p2184_p5 = scmp.ne.s32.totalorder %s2936_s3, %s2183_s15  ;;  %p2190_p12 = scmp.lt.u32.totalorder %s2183_s15, %s2936_s3 }
  0x3b   : > { %p2186_p10 = pnand %p2184_p5, %p2541_p8 }
  0x3d   : > { %p2187_p11 = pneg %p2186_p10 }
  0x3f   : > { %p2192_p13 = pnand %p2190_p12, %p2187_p11 }
  0x41   : > { %2195 = shalt.err (!%p2192_p13)
}
  0x42   : > { %s2196_s30 = scalar_lea.vmem %s2529_s9, 2048  ;;  %p2204_p7 = scmp.lt.s32.totalorder %s2529_s9, %s2529_s9 }
  0x43   : > { %p2197_p0 = scmp.ne.s32.totalorder %s2529_s9, %s2196_s30  ;;  %p2205_p9 = scmp.lt.s32.totalorder %s2196_s30, %s2196_s30 }
  0x45   : > { %p2199_p2 = pnand %p2197_p0, %p2541_p8  ;;  %p2206_p5 = por %p2205_p9, %p2204_p7 }
  0x47   : > { %p2200_p4 = pneg %p2199_p2 }
  0x49   : > { %p2207_p10 = pnand %p2206_p5, %p2200_p4 }
  0x4b   : > { %2210 = shalt.err (!%p2207_p10)
}
  0x4c   : > { %1970 = dma.hbm_to_vmem [thread:$0]  (!%p2525_p6), %s2936_s3, 2048, %s2529_s9, [#allocation9], %s2430_s29, %s2430_s29, %s2431_s8  }
  0x4d   : > { %s2937_s4 = sld [smem:[#allocation23_spill]] }
  0x53   : > { %s2211_s15 = scalar_lea.hbm %s2937_s4, 2048 }
  0x54   : > { %p2212_p11 = scmp.ne.s32.totalorder %s2937_s4, %s2211_s15  ;;  %p2218_p0 = scmp.lt.u32.totalorder %s2211_s15, %s2937_s4 }
  0x56   : > { %p2214_p12 = pnand %p2212_p11, %p2541_p8 }
  0x58   : > { %p2215_p13 = pneg %p2214_p12 }
  0x5a   : > { %p2220_p2 = pnand %p2218_p0, %p2215_p13 }
  0x5c   : > { %2223 = shalt.err (!%p2220_p2)
}
  0x5d   : > { %s2224_s30 = scalar_lea.vmem %s249_s11, 2048  ;;  %p2232_p5 = scmp.lt.s32.totalorder %s249_s11, %s249_s11 }
  0x5e   : > { %p2225_p4 = scmp.ne.s32.totalorder %s249_s11, %s2224_s30  ;;  %p2233_p10 = scmp.lt.s32.totalorder %s2224_s30, %s2224_s30 }
  0x60   : > { %p2227_p7 = pnand %p2225_p4, %p2541_p8  ;;  %p2234_p1 = por %p2233_p10, %p2232_p5 }
  0x62   : > { %p2228_p9 = pneg %p2227_p7 }
  0x64   : > { %p2235_p3 = pnand %p2234_p1, %p2228_p9 }
  0x66   : > { %2238 = shalt.err (!%p2235_p3)
}
  0x67   : > { %1973 = dma.hbm_to_vmem [thread:$0]  (!%p2525_p6), %s2937_s4, 2048, %s249_s11, [#allocation9], %s2430_s29, %s2430_s29, %s2431_s8  }
  0x68   : > { %s2432_s12 = smov [#allocation11]   ;;  %s2938_s5 = sld [smem:[#allocation24_spill]] }
  0x69   : > { %s261_s13 = sshll.u32 %s2432_s12, 4  ;;  %s262_s13 = int_to_ptr.vmem [resolvable:$true] %s261_s13 }
  0x6e   : > { %s2239_s16 = scalar_lea.hbm %s2938_s5, 2048 }
  0x6f   : > { %p2240_p1 = scmp.ne.s32.totalorder %s2938_s5, %s2239_s16  ;;  %p2246_p12 = scmp.lt.u32.totalorder %s2239_s16, %s2938_s5 }
  0x71   : > { %p2242_p3 = pnand %p2240_p1, %p2541_p8 }
  0x73   : > { %p2243_p11 = pneg %p2242_p3 }
  0x75   : > { %p2248_p13 = pnand %p2246_p12, %p2243_p11 }
  0x77   : > { %2251 = shalt.err (!%p2248_p13)
}
  0x78   : > { %s2252_s11 = scalar_lea.vmem %s262_s13, 2048  ;;  %p2260_p7 = scmp.lt.s32.totalorder %s262_s13, %s262_s13 }
  0x79   : > { %p2253_p0 = scmp.ne.s32.totalorder %s262_s13, %s2252_s11  ;;  %p2261_p9 = scmp.lt.s32.totalorder %s2252_s11, %s2252_s11 }
  0x7b   : > { %p2255_p2 = pnand %p2253_p0, %p2541_p8  ;;  %p2262_p5 = por %p2261_p9, %p2260_p7 }
  0x7d   : > { %p2256_p4 = pneg %p2255_p2 }
  0x7f   : > { %p2263_p10 = pnand %p2262_p5, %p2256_p4 }
  0x81   : > { %2266 = shalt.err (!%p2263_p10)
}
  0x82   : > { %s2433_s29 = smov 64   ;;  %s2434_s17 = smov 4  }
  0x83   : > { %1976 = dma.hbm_to_vmem [thread:$0]  (!%p2525_p6), %s2938_s5, 2048, %s262_s13, [#allocation12], %s2433_s29, %s2433_s29, %s2434_s17  }
  0x84   : > { %s1791_s10 = sadd.s32 4294967294, %s2425_s26   ;;  %s39_s12 = sadd.s32 1, %s2421_s25 }
  0x85   : > { %p41_p8 = scmp.ge.s32.totalorder %s39_s12, 2  ;;  %s48_s14 = sadd.s32 1, %s2413_s23 }
  0x86   : > { %p55_p1 = scmp.ne.s32.totalorder %s2413_s23, %s2409_s22  ;;  %p56_p3 = scmp.eq.s32.totalorder %s2425_s26, 0 }
  0x87   : > { %s2964_s12 = smov (%p41_p8, %s39_s12), 0  ;;  %p61_p12 = scmp.ne.s32.totalorder %s2409_s22, %s2405_s21 }
  0x88   : > { %2939 = sst [smem:[#allocation20_spill]] %s2964_s12  ;;  %p2639_p11 = por %p56_p3, %p55_p1 }
  0x89   : > { %s43_s7 = ssub.s32 %s2421_s25, %s2964_s12  ;;  %p197_p6 = scmp.eq.s32.totalorder %s2509_s27, 1 }
  0x8a   : > { %p46_p13 = scmp.eq.s32.totalorder %s43_s7, 0  ;;  %p2941_p0 = scmp.eq.s32.totalorder %s2509_s27, 0 }
  0x8b   : > { %p2654_p4 = por %p197_p6, %p55_p1  ;;  %p203_p7 = scmp.eq.s32.totalorder %s1791_s10, 1 }
  0x8c   : > { %p2650_p2 = por %p2941_p0, %p61_p12  ;;  %p1992_p5 = scmp.lt.s32.totalorder %s2425_s26, 2 }
  0x8d   : > { %s2943_s16 = scalar_select %p2654_p4, 1, 0 }
  0x8e   : > { %s2942_s13 = scalar_select %p2650_p2, 1, 0 }
  0x8f   : > { %s2659_s18 = scalar_select %p46_p13, %s2413_s23, %s48_s14  }
  0x90   : > { %p2661_p9 = por %p203_p7, %p61_p12  ;;  %s275_s20 = sand.u32 1, %s2413_s23  }
  0x91   : > { %s1799_s30 = sshll.u32 %s2421_s25, 6  ;;  %s2668_s11 = sshll.u32 %s275_s20, 2 }
  0x92   : > { %s2944_s19 = scalar_select %p2661_p9, 1, 0 }
  0x93   : > { %s2673_s8 = scalar_lea.hbm %s2916_s0, %s1799_s30  ;;  %s279_s9 = scalar_lea.vmem [#allocation2], %s2668_s11 }
  0x94   : > { %s287_s10 = sshll.u32 %s279_s9, 4  ;;  %p2678_p10 = pnand %p1992_p5, %p2639_p11  ;;  %s2682_s10 = int_to_ptr.vmem [resolvable:$true] %s287_s10 }
  0x95   : > { %s2687_s17 = scalar_lea.hbm %s2917_s1, %s1799_s30  ;;  %s276_s2 = scalar_lea.sflag [#allocation3], %s275_s20 }
  0x96   : > { %s2267_s3 = scalar_lea.hbm %s2673_s8, 64  ;;  %p2269_p1 = pneg %p2678_p10 }
  0x97   : > { %p2268_p8 = scmp.ne.s32.totalorder %s2673_s8, %s2267_s3  ;;  %s2272_s4 = scalar_lea.hbm %s2916_s0, 128 }
  0x98   : > { %p2273_p12 = scmp.lt.u32.totalorder %s2673_s8, %s2916_s0  ;;  %p2274_p6 = scmp.lt.u32.totalorder %s2272_s4, %s2267_s3 }
  0x99   : > { %p2270_p3 = pnand %p2269_p1, %p2268_p8  ;;  %p2276_p0 = scmp.lt.u32.totalorder %s2267_s3, %s2673_s8 }
  0x9a   : > { %p2275_p13 = por %p2274_p6, %p2273_p12 }
  0x9b   : > { %p2271_p11 = pneg %p2270_p3 }
  0x9c   : > { %p2277_p7 = por %p2276_p0, %p2275_p13 }
  0x9e   : > { %p2278_p5 = pnand %p2277_p7, %p2271_p11 }
  0xa0   : > { %2281 = shalt.err (!%p2278_p5)
}
  0xa1   : > { %s2282_s20 = scalar_lea.vmem %s2682_s10, 64  ;;  %s2435_s30 = smov [#allocation2]  }
  0xa2   : > { %p2283_p8 = scmp.ne.s32.totalorder %s2682_s10, %s2282_s20  ;;  %s2287_s7 = sshll.u32 %s2435_s30, 4  ;;  %s2288_s7 = int_to_ptr.vmem [resolvable:$false] %s2287_s7 }
  0xa3   : > { %s2289_s5 = scalar_lea.vmem %s2288_s7, 128  ;;  %p2290_p4 = scmp.lt.s32.totalorder %s2682_s10, %s2288_s7 }
  0xa4   : > { %p2285_p3 = pnand %p2283_p8, %p2269_p1  ;;  %p2291_p12 = scmp.lt.s32.totalorder %s2289_s5, %s2282_s20 }
  0xa6   : > { %p2286_p9 = pneg %p2285_p3  ;;  %p2292_p6 = por %p2291_p12, %p2290_p4 }
  0xa8   : > { %p2293_p13 = pnand %p2292_p6, %p2286_p9 }
  0xaa   : > { %2296 = shalt.err (!%p2293_p13)
}
  0xab   : > { %1980 = dma.hbm_to_vmem [thread:$0]  (!%p2678_p10), %s2673_s8, 64, %s2682_s10, %s276_s2  }
  0xac   : > { %s294_s3 = sand.u32 1, %s2425_s26   ;;  %s298_s4 = scalar_lea.vmem [#allocation5], %s2668_s11 }
  0xad   : > { %s305_s12 = sshll.u32 %s298_s4, 4  ;;  %s295_s29 = scalar_lea.sflag [#allocation6], %s294_s3  ;;  %s306_s12 = int_to_ptr.vmem [resolvable:$true] %s305_s12 }
  0xae   : > { %s2297_s15 = scalar_lea.hbm %s2687_s17, 64  ;;  %s2302_s30 = scalar_lea.hbm %s2917_s1, 128 }
  0xaf   : > { %p2298_p4 = scmp.ne.s32.totalorder %s2687_s17, %s2297_s15  ;;  %p2303_p0 = scmp.lt.u32.totalorder %s2687_s17, %s2917_s1 }
  0xb0   : > { %p2304_p7 = scmp.lt.u32.totalorder %s2302_s30, %s2297_s15  ;;  %p2306_p8 = scmp.lt.u32.totalorder %s2297_s15, %s2687_s17 }
  0xb1   : > { %p2300_p9 = pnand %p2298_p4, %p2269_p1 }
  0xb2   : > { %p2305_p5 = por %p2304_p7, %p2303_p0 }
  0xb3   : > { %p2301_p11 = pneg %p2300_p9 }
  0xb4   : > { %p2307_p3 = por %p2306_p8, %p2305_p5 }
  0xb6   : > { %p2308_p12 = pnand %p2307_p3, %p2301_p11 }
  0xb8   : > { %2311 = shalt.err (!%p2308_p12)
}
  0xb9   : > { %s2312_s2 = scalar_lea.vmem %s306_s12, 64  ;;  %s2436_s11 = smov [#allocation5]  }
  0xba   : > { %p2313_p6 = scmp.ne.s32.totalorder %s306_s12, %s2312_s2  ;;  %s2317_s8 = sshll.u32 %s2436_s11, 4  ;;  %s2318_s8 = int_to_ptr.vmem [resolvable:$false] %s2317_s8 }
  0xbb   : > { %s2319_s10 = scalar_lea.vmem %s2318_s8, 128  ;;  %p2320_p9 = scmp.lt.s32.totalorder %s306_s12, %s2318_s8 }
  0xbc   : > { %p2315_p13 = pnand %p2313_p6, %p2269_p1  ;;  %p2321_p2 = scmp.lt.s32.totalorder %s2319_s10, %s2312_s2 }
  0xbe   : > { %p2316_p4 = pneg %p2315_p13  ;;  %p2322_p0 = por %p2321_p2, %p2320_p9 }
  0xc0   : > { %p2323_p7 = pnand %p2322_p0, %p2316_p4 }
  0xc2   : > { %2326 = shalt.err (!%p2323_p7)
}
  0xc3   : > { %1983 = dma.hbm_to_vmem [thread:$0]  (!%p2678_p10), %s2687_s17, 64, %s306_s12, %s295_s29  }
  0xc4   : > { %p2946_p11 = scmp.ne.s32.totalorder %s2932_s28, 0 }
  0xc5   : > { %s2738_s3 = sand.u32 (!%p2946_p11), 1, %s2409_s22   ;;  %p2947_p2 = scmp.ne.s32.totalorder (!%p2946_p11), %s2942_s13, 0 }
  0xc6   : > { %314 = sbr.rel (%p2946_p11) target bundleno = 1491 (0x5d3), region = 44  ;;  %s1803_s4 = sshll.u32 (!%p2946_p11), %s2738_s3, 2 }
  0xc7   : > { %s317_s15 = scalar_lea.sflag (!%p2946_p11), [#allocation3], %s2738_s3  ;;  %s2742_s9 = scalar_lea.vmem (!%p2946_p11), [#allocation2], %s1803_s4 }
  0xcd   : > { %2380 = dma.done.wait (%p2947_p2), %s317_s15, 64  }
  0xce   : > { %2382 = vsyncadd (%p2947_p2), %s317_s15, 4294967232  ;;  %s325_s14 = sand.u32 1, %s2509_s27   ;;  %s2749_s17 = scalar_lea.vmem [#allocation5], %s1803_s4 }
  0xcf   : > { %s326_s28 = scalar_lea.sflag [#allocation6], %s325_s14 }
  0xd0   : > { %2384 = dma.done.wait (%p2947_p2), %s326_s28, 64  }
  0xd1   : > { %2386 = vsyncadd (%p2947_p2), %s326_s28, 4294967232  ;;  %p2948_p10 = scmp.eq.s32.totalorder %s2509_s27, 0 }
  0xd3   : > { %2388 = dma.done.wait (%p2948_p10), [#allocation6], 2048   ;;  %p2949_p1 = pmov %p2948_p10 }
  0xd5   : > { %2390 = vsyncadd (%p2949_p1), [#allocation6], 4294965248  ;;  %p2950_p5 = pmov %p2949_p1 }
  0xd6   : > { %p2951_p8 = pmov %p2949_p1 }
  0xd7   : > { %2392 = dma.done.wait (%p2950_p5), [#allocation9], 4096  }
  0xd8   : > { %2394 = vsyncadd (%p2951_p8), [#allocation9], 4294963200  ;;  %p2952_p3 = pmov %p2949_p1 }
  0xd9   : > { %p2953_p12 = pmov %p2949_p1 }
  0xda   : > { %2396 = dma.done.wait (%p2952_p3), [#allocation12], 2048  }
  0xdb   : > { %2398 = vsyncadd (%p2953_p12), [#allocation12], 4294965248  ;;  %v2437_v0 = vmov 0   ;;  %v2059_v1 = vld [vmem:[#allocation8 + $0x4] ss:$8 sps:$4 sm:$0xff]   ;;  %v2438_v35 = vmov 0.0   ;;  %v799_v38 = vlaneseq }
  0xdc   : > { %647 = vmatprep.mubr.bf16.mxu1 %v2437_v0  ;;  %510 = vmatprep.mubr.bf16.mxu0 %v2437_v0  ;;  %v2061_v2 = vld [vmem:[#allocation8] ss:$8 sps:$4 sm:$0xff]   ;;  %v2062_v3 = vld [vmem:[#allocation7 + $0x4] ss:$8 sps:$4 sm:$0xff]   ;;  %v2065_v5 = vld [vmem:[#allocation8 + $0x14] ss:$8 sps:$4 sm:$0xff]  }
  0xdd   : > { %615 = vmatprep.subr.bf16.mxu1 %v2059_v1  ;;  %v2064_v4 = vld [vmem:[#allocation7] ss:$8 sps:$4 sm:$0xff]   ;;  %v2067_v6 = vld [vmem:[#allocation8 + $0x10] ss:$8 sps:$4 sm:$0xff]   ;;  %478 = vmatprep.subr.bf16.mxu0 %v2062_v3  ;;  %v2068_v7 = vld [vmem:[#allocation7 + $0x14] ss:$8 sps:$4 sm:$0xff]  }
  0xde   : > { %616 = vmatpush1.bf16.msra.mxu1 %v2061_v2  ;;  %479 = vmatpush1.bf16.msra.mxu0 %v2064_v4  ;;  %v2070_v8 = vld [vmem:[#allocation7 + $0x10] ss:$8 sps:$4 sm:$0xff]   ;;  %v2071_v9 = vld [vmem:[#allocation8 + $0x24] ss:$8 sps:$4 sm:$0xff]   ;;  %v2073_v10 = vld [vmem:[#allocation8 + $0x20] ss:$8 sps:$4 sm:$0xff]  }
  0xdf   : > { %617 = vmatprep.subr.bf16.mxu1 %v2065_v5  ;;  %480 = vmatprep.subr.bf16.mxu0 %v2068_v7  ;;  %v2074_v11 = vld [vmem:[#allocation7 + $0x24] ss:$8 sps:$4 sm:$0xff]   ;;  %v2077_v12 = vld [vmem:[#allocation8 + $0x34] ss:$8 sps:$4 sm:$0xff]   ;;  %v2076_v13 = vld [vmem:[#allocation7 + $0x20] ss:$8 sps:$4 sm:$0xff]  }
  0xe0   : > { %v2080_v14 = vld [vmem:[#allocation7 + $0x34] ss:$8 sps:$4 sm:$0xff]   ;;  %v2079_v15 = vld [vmem:[#allocation8 + $0x30] ss:$8 sps:$4 sm:$0xff]   ;;  %v2083_v16 = vld [vmem:[#allocation8 + $0x44] ss:$8 sps:$4 sm:$0xff]  }
  0xe1   : > { %v2082_v17 = vld [vmem:[#allocation7 + $0x30] ss:$8 sps:$4 sm:$0xff]   ;;  %v2086_v18 = vld [vmem:[#allocation7 + $0x44] ss:$8 sps:$4 sm:$0xff]   ;;  %v2085_v19 = vld [vmem:[#allocation8 + $0x40] ss:$8 sps:$4 sm:$0xff]  }
  0xe2   : > { %618 = vmatpush1.bf16.msra.mxu1 %v2067_v6  ;;  %481 = vmatpush1.bf16.msra.mxu0 %v2070_v8  ;;  %v2089_v20 = vld [vmem:[#allocation8 + $0x54] ss:$8 sps:$4 sm:$0xff]   ;;  %v2088_v21 = vld [vmem:[#allocation7 + $0x40] ss:$8 sps:$4 sm:$0xff]   ;;  %v2091_v23 = vld [vmem:[#allocation8 + $0x50] ss:$8 sps:$4 sm:$0xff]  }
  0xe3   : > { %619 = vmatprep.subr.bf16.mxu1 %v2071_v9  ;;  %482 = vmatprep.subr.bf16.mxu0 %v2074_v11  ;;  %v2092_v22 = vld [vmem:[#allocation7 + $0x54] ss:$8 sps:$4 sm:$0xff]   ;;  %v2095_v24 = vld [vmem:[#allocation8 + $0x64] ss:$8 sps:$4 sm:$0xff]   ;;  %v2094_v25 = vld [vmem:[#allocation7 + $0x50] ss:$8 sps:$4 sm:$0xff]  }
  0xe4   : > { %v2097_v26 = vld [vmem:[#allocation8 + $0x60] ss:$8 sps:$4 sm:$0xff]   ;;  %v2098_v27 = vld [vmem:[#allocation7 + $0x64] ss:$8 sps:$4 sm:$0xff]   ;;  %v2101_v28 = vld [vmem:[#allocation8 + $0x74] ss:$8 sps:$4 sm:$0xff]  }
  0xe5   : > { %v2100_v29 = vld [vmem:[#allocation7 + $0x60] ss:$8 sps:$4 sm:$0xff]   ;;  %v2104_v30 = vld [vmem:[#allocation7 + $0x74] ss:$8 sps:$4 sm:$0xff]   ;;  %v2103_v31 = vld [vmem:[#allocation8 + $0x70] ss:$8 sps:$4 sm:$0xff]  }
  0xe6   : > { %620 = vmatpush1.bf16.msra.mxu1 %v2073_v10  ;;  %483 = vmatpush1.bf16.msra.mxu0 %v2076_v13  ;;  %v2106_v32 = vld [vmem:[#allocation7 + $0x70] ss:$8 sps:$4 sm:$0xff]   ;;  %vm2439_vm0 = vmmov 0   ;;  %v2440_v36 = vmov 1983009808   ;;  %v800_v40 = vshrl.u32 %v799_v38, 7 }
  0xe7   : > { %621 = vmatprep.subr.bf16.mxu1 %v2077_v12  ;;  %484 = vmatprep.subr.bf16.mxu0 %v2080_v14  ;;  %v2770_v33 = vld [vmem:[%s2749_s17] sm:$0xf]  ;;  %v380_v34 = vld [vmem:[%s2742_s9] sm:$0xf]  ;;  %v797_v37 = vunpack.c.l.s4 %v2440_v36  ;;  %v2441_v41 = vmov 1934713408  }
  0xe8   : > { %v828_v42 = vunpack.c.l.s4 %v2441_v41  ;;  %vm1227_vm1 = vcmask 64512   ;;  %vm1257_vm2 = vcmask 1043456   ;;  %s1809_s27 = sshll.u32 %s2738_s3, 3  ;;  %s1885_s13 = sshll.u32 %s2417_s24, 7 }
  0xe9   : > { %v798_v39 = vunpack.c.0.s8 %v797_v37  ;;  %s378_s12 = scalar_lea.vmem [#allocation13], %s1809_s27  ;;  %s2867_s7 = scalar_lea.hbm %s2922_s6, %s1885_s13 }
  0xea   : > { %622 = vmatpush1.bf16.msra.mxu1 %v2079_v15  ;;  %485 = vmatpush1.bf16.msra.mxu0 %v2082_v17  ;;  %v829_v44 = vunpack.c.0.s8 %v828_v42  ;;  %s1649_s29 = sshll.u32 %s378_s12, 4  ;;  %s1635_s5 = scalar_lea.sflag [#allocation4], %s2738_s3  ;;  %s2869_s29 = int_to_ptr.vmem [resolvable:$true] %s1649_s29 }
  0xeb   : > { %623 = vmatprep.subr.bf16.mxu1 %v2083_v16  ;;  %486 = vmatprep.subr.bf16.mxu0 %v2086_v18  ;;  %v2778_v43 = vsub.s32 %v798_v39, %v800_v40  ;;  %s2327_s24 = scalar_lea.vmem %s2869_s29, 128  ;;  %p2954_p13 = scmp.ne.s32.totalorder %s2943_s16, 0 }
  0xec   : > { %v2782_v49 = vsub.s32 %v829_v44, %v800_v40  ;;  %p2328_p6 = scmp.ne.s32.totalorder %s2869_s29, %s2327_s24  ;;  %s2442_s2 = smov [#allocation13]  }
  0xed   : > { %s2331_s11 = sshll.u32 %s2442_s2, 4  ;;  %s2332_s11 = int_to_ptr.vmem [resolvable:$false] %s2331_s11 }
  0xee   : > { %624 = vmatpush1.bf16.msra.mxu1 %v2085_v19  ;;  %487 = vmatpush1.bf16.msra.mxu0 %v2088_v21  ;;  %p2329_p4 = pnand %p2328_p6, %p2954_p13  ;;  %s2333_s8 = scalar_lea.vmem %s2332_s11, 256 }
  0xef   : > { %625 = vmatprep.subr.bf16.mxu1 %v2089_v20  ;;  %488 = vmatprep.subr.bf16.mxu0 %v2092_v22  ;;  %p2334_p0 = scmp.lt.s32.totalorder %s2869_s29, %s2332_s11  ;;  %p2335_p7 = scmp.lt.s32.totalorder %s2333_s8, %s2327_s24 }
  0xf0   : > { %p2330_p9 = pneg %p2329_p4 }
  0xf1   : > { %p2336_p11 = por %p2335_p7, %p2334_p0 }
  0xf2   : > { %626 = vmatpush1.bf16.msra.mxu1 %v2091_v23  ;;  %489 = vmatpush1.bf16.msra.mxu0 %v2094_v25 }
  0xf3   : > { %627 = vmatprep.subr.bf16.mxu1 %v2095_v24  ;;  %490 = vmatprep.subr.bf16.mxu0 %v2098_v27  ;;  %p2337_p2 = pnand %p2336_p11, %p2330_p9 }
  0xf6   : > { %628 = vmatpush1.bf16.msra.mxu1 %v2097_v26  ;;  %491 = vmatpush1.bf16.msra.mxu0 %v2100_v29 }
  0xf7   : > { %629 = vmatprep.subr.bf16.mxu1 %v2101_v28  ;;  %492 = vmatprep.subr.bf16.mxu0 %v2104_v30 }
  0xfa   : > { %630 = vmatpush1.bf16.msra.mxu1 %v2103_v31  ;;  %493 = vmatpush1.bf16.msra.mxu0 %v2106_v32 }
  0xfb   : > { %1918 = vmatprep.subr.bf16.mxu1 %v2438_v35 }
  0xfd   : > { %648 = vmatmul.mubr.bf16.vlgmr.msra.gmra.mrb[0].mxu1 %v2770_v33  ;;  %511 = vmatmul.mubr.bf16.vlgmr.msra.gmra.mrb[0].mxu0 %v380_v34 }
  0xfe   : > { %784 = vmatprep.mubr.bf16.mxu0 %v2437_v0  ;;  %1920 = vmatprep.mubr.msk.bf16.mxu1 %vm2439_vm0, %v2438_v35 }
 0x1d0   : > { %v649_v45 = vpop.f32.mrb[0].mxu1  ;;  %v512_v53 = vpop.f32.mrb[0].mxu0 }
 0x1d1   : > { %v911_v46 = vcombine.high %v649_v45, %v2438_v35  ;;  %v918_v47 = vrot.slane %v649_v45, %v2778_v43  ;;  %v651_v48 = vpop.f32.mrb[1].mxu1  ;;  %v793_v55 = vmul.f32 0.4472136, %v512_v53  ;;  %v514_v57 = vpop.f32.mrb[1].mxu0 }
 0x1d2   : > { %v926_v50 = vcombine.high %v651_v48, %v2438_v35  ;;  %v933_v51 = vrot.slane %v651_v48, %v2778_v43  ;;  %v653_v52 = vpop.f32.mrb[2].mxu1  ;;  %v794_v61 = vmul.f32 0.4472136, %v514_v57  ;;  %v516_v62 = vpop.f32.mrb[2].mxu0  ;;  %v2109_v57 = vld [vmem:[#allocation10 + $0x4] ss:$8 sps:$4 sm:$0xff]  }
 0x1d3   : > { %v925_v54 = vrot.slane %v911_v46, %v2778_v43  ;;  %v654_v56 = vpop.f32.mrb[3].mxu1  ;;  %v795_v63 = vcombine.high %v793_v55, %v2438_v35  ;;  %v802_v0 = vrot.slane %v793_v55, %v2778_v43  ;;  %v517_v1 = vpop.f32.mrb[3].mxu0  ;;  %752 = vmatprep.subr.bf16.mxu0 %v2109_v57  ;;  %v2118_v62 = vld [vmem:[#allocation10 + $0x34] ss:$8 sps:$4 sm:$0xff]  }
 0x1d4   : > { %v940_v58 = vrot.slane %v926_v50, %v2778_v43  ;;  %v941_v59 = vcombine.low %v918_v47, %v933_v51  ;;  %v942_v60 = vcombine.high %v918_v47, %v933_v51  ;;  %v810_v7 = vcombine.high %v794_v61, %v2438_v35  ;;  %v2107_v56 = vld [vmem:[#allocation10] ss:$8 sps:$4 sm:$0xff]  }
 0x1d5   : > { %v809_v6 = vrot.slane %v795_v63, %v2778_v43  ;;  %v817_v8 = vrot.slane %v794_v61, %v2778_v43  ;;  %753 = vmatpush1.bf16.msra.mxu0 %v2107_v56  ;;  %v2113_v61 = vld [vmem:[#allocation10 + $0x20] ss:$8 sps:$4 sm:$0xff]   ;;  %v2116_v63 = vld [vmem:[#allocation10 + $0x30] ss:$8 sps:$4 sm:$0xff]  }
 0x1d6   : > { %v949_v2 = vrot.slane %v941_v59, %v2782_v49  ;;  %v956_v3 = vrot.slane %v942_v60, %v2782_v49  ;;  %v957_v4 = vcombine.low %v925_v54, %v940_v58  ;;  %v958_v5 = vcombine.high %v925_v54, %v940_v58  ;;  %v2112_v58 = vld [vmem:[#allocation10 + $0x14] ss:$8 sps:$4 sm:$0xff]   ;;  %v2110_v59 = vld [vmem:[#allocation10 + $0x10] ss:$8 sps:$4 sm:$0xff]   ;;  %v2115_v60 = vld [vmem:[#allocation10 + $0x24] ss:$8 sps:$4 sm:$0xff]  }
 0x1d7   : > { %v824_v13 = vrot.slane %v810_v7, %v2778_v43  ;;  %v825_v14 = vcombine.low %v802_v0, %v817_v8  ;;  %v826_v15 = vcombine.high %v802_v0, %v817_v8  ;;  %754 = vmatprep.subr.bf16.mxu0 %v2112_v58  ;;  %v2121_v0 = vld [vmem:[#allocation10 + $0x44] ss:$8 sps:$4 sm:$0xff]   ;;  %v2119_v1 = vld [vmem:[#allocation10 + $0x40] ss:$8 sps:$4 sm:$0xff]   ;;  %v2128_v7 = vld [vmem:[#allocation10 + $0x70] ss:$8 sps:$4 sm:$0xff]  }
 0x1d8   : > { %v965_v9 = vrot.slane %v957_v4, %v2782_v49  ;;  %v972_v10 = vrot.slane %v958_v5, %v2782_v49  ;;  %v977_v11 = vcombine.low %v949_v2, %v956_v3  ;;  %v1860_v12 = vcombine.high %v949_v2, %v956_v3  ;;  %v2124_v2 = vld [vmem:[#allocation10 + $0x54] ss:$8 sps:$4 sm:$0xff]   ;;  %v2122_v3 = vld [vmem:[#allocation10 + $0x50] ss:$8 sps:$4 sm:$0xff]   ;;  %v2127_v4 = vld [vmem:[#allocation10 + $0x64] ss:$8 sps:$4 sm:$0xff]  }
 0x1d9   : > { %v833_v20 = vrot.slane %v825_v14, %v2782_v49  ;;  %v840_v21 = vrot.slane %v826_v15, %v2782_v49  ;;  %v841_v22 = vcombine.low %v809_v6, %v824_v13  ;;  %v842_v23 = vcombine.high %v809_v6, %v824_v13  ;;  %755 = vmatpush1.bf16.msra.mxu0 %v2110_v59  ;;  %v2125_v5 = vld [vmem:[#allocation10 + $0x60] ss:$8 sps:$4 sm:$0xff]   ;;  %v2130_v6 = vld [vmem:[#allocation10 + $0x74] ss:$8 sps:$4 sm:$0xff]  }
 0x1da   : > { %v984_v16 = vrot.slane %v977_v11, %v2778_v43  ;;  %v992_v17 = vrot.slane %v1860_v12, %v2778_v43  ;;  %v993_v18 = vcombine.low %v965_v9, %v972_v10  ;;  %v1861_v19 = vcombine.high %v965_v9, %v972_v10  ;;  %756 = vmatprep.subr.bf16.mxu0 %v2115_v60 }
 0x1db   : > { %v849_v27 = vrot.slane %v841_v22, %v2782_v49  ;;  %v856_v28 = vrot.slane %v842_v23, %v2782_v49  ;;  %v861_v29 = vcombine.low %v833_v20, %v840_v21  ;;  %v1858_v30 = vcombine.high %v833_v20, %v840_v21 }
 0x1dc   : > { %v1000_v24 = vrot.slane %v993_v18, %v2778_v43  ;;  %v1008_v25 = vrot.slane %v1861_v19, %v2778_v43  ;;  %v1009_v26 = vcombine.low %v984_v16, %v992_v17 }
 0x1dd   : > { %v868_v32 = vrot.slane %v861_v29, %v2778_v43  ;;  %v876_v34 = vrot.slane %v1858_v30, %v2778_v43  ;;  %v877_v36 = vcombine.low %v849_v27, %v856_v28  ;;  %v1859_v37 = vcombine.high %v849_v27, %v856_v28  ;;  %757 = vmatpush1.bf16.msra.mxu0 %v2113_v61 }
 0x1de   : > { %v1017_v31 = vcombine.low %v1000_v24, %v1008_v25  ;;  %v1016_v38 = vrot.slane %v1009_v26, %v2782_v49  ;;  %758 = vmatprep.subr.bf16.mxu0 %v2118_v62 }
 0x1df   : > { %v884_v40 = vrot.slane %v877_v36, %v2778_v43  ;;  %v892_v41 = vrot.slane %v1859_v37, %v2778_v43  ;;  %v893_v42 = vcombine.low %v868_v32, %v876_v34 }
 0x1e0   : > { %v1024_v39 = vrot.slane %v1017_v31, %v2782_v49 }
 0x1e1   : > { %v900_v46 = vrot.slane %v893_v42, %v2782_v49  ;;  %v901_v47 = vcombine.low %v884_v40, %v892_v41  ;;  %759 = vmatpush1.bf16.msra.mxu0 %v2116_v63 }
 0x1e2   : > { %v1025_v44 = vcombine.low %v1016_v38, %v1024_v39  ;;  %v1026_v45 = vcombine.high %v1016_v38, %v1024_v39  ;;  %760 = vmatprep.subr.bf16.mxu0 %v2121_v0 }
 0x1e3   : > { %v908_v50 = vrot.slane %v901_v47, %v2782_v49 }
 0x1e4   : > { %v1145_v48 = vpack.c.bf16 %v1025_v44, %v1025_v44  ;;  %v1146_v54 = vpack.c.bf16 %v1026_v45, %v1026_v45 }
 0x1e5   : > { %v909_v51 = vcombine.low %v900_v46, %v908_v50  ;;  %v910_v52 = vcombine.high %v900_v46, %v908_v50  ;;  %761 = vmatpush1.bf16.msra.mxu0 %v2119_v1 }
 0x1e6   : > { %1919 = vmatpush3.bf16.xpose.msra.mxu1 %v1145_v48  ;;  %762 = vmatprep.subr.bf16.mxu0 %v2124_v2 }
 0x1e7   : > { %1924 = vmatprep.subr.bf16.mxu1 %v2438_v35  ;;  %v1143_v53 = vpack.c.bf16 %v909_v51, %v909_v51  ;;  %v1144_v55 = vpack.c.bf16 %v910_v52, %v910_v52 }
 0x1e9   : > { %763 = vmatpush1.bf16.msra.mxu0 %v2122_v3  ;;  %v2131_v3 = vld [vmem:[#allocation11 + $0x40] sm:$0xff]  }
 0x1ea   : > { %764 = vmatprep.subr.bf16.mxu0 %v2127_v4  ;;  %v2132_v4 = vld [vmem:[#allocation11] sm:$0xff]  }
 0x1ed   : > { %1921 = vmatmul.mubr.bf16.vlgmr.msra.gmra.mrb[4].mxu1 %v1143_v53  ;;  %765 = vmatpush1.bf16.msra.mxu0 %v2125_v5 }
 0x1ee   : > { %1925 = vmatpush3.bf16.xpose.msra.mxu1 %v1146_v54  ;;  %1926 = vmatprep.mubr.msk.bf16.mxu1 %vm2439_vm0, %v2438_v35 }
 0x1ef   : > { %1930 = vmatprep.subr.bf16.mxu1 %v2438_v35  ;;  %766 = vmatprep.subr.bf16.mxu0 %v2130_v6 }
 0x1f1   : > { %767 = vmatpush1.bf16.msra.mxu0 %v2128_v7 }
 0x1f2   : > { %1896 = vmatprep.subr.bf16.mxu0 %v2131_v3 }
 0x1f4   : > { %785 = vmatmul.mubr.bf16.vlgmr.msra.gmra.mrb[4].mxu0 %v2770_v33 }
 0x1f5   : > { %1927 = vmatmul.mubr.bf16.vlgmr.msra.gmra.mrb[8].mxu1 %v1144_v55  ;;  %1897 = vmatpush3.bf16.msra.mxu0 %v2132_v4 }
 0x1f6   : > { %1932 = vmatprep.mubr.msk.bf16.mxu1 %vm2439_vm0, %v2438_v35 }
 0x2c0   : > { %v1181_v8 = vpop.f32.mrb[4].mxu1 }
 0x2c1   : > { %v1922_v9 = vpop.f32.mrb[5].mxu1  ;;  %v1228_v10 = vsel %vm1227_vm1, %v1181_v8, -inf }
 0x2c2   : > { %1229 = vmax.xlane.f32.xlu0 %v1228_v10  ;;  %v1184_v11 = vpop.f32.mrb[6].mxu1 }
 0x2c3   : > { %v1923_v12 = vpop.f32.mrb[7].mxu1 }
 0x2c7   : > { %v786_v18 = vpop.f32.mrb[4].mxu0 }
 0x2c8   : > { %v1221_v13 = vpop.f32.mrb[8].mxu1  ;;  %v1027_v19 = vcombine.high %v786_v18, %v2438_v35  ;;  %v1034_v33 = vrot.slane %v786_v18, %v2778_v43  ;;  %v788_v20 = vpop.f32.mrb[5].mxu0  ;;  %v2138_v18 = vld [vmem:[#allocation11 + $0x18] sm:$0xff]  }
 0x2c9   : > { %v1928_v14 = vpop.f32.mrb[9].mxu1  ;;  %v1231_v15 = vsel %vm1227_vm1, %v1221_v13, -inf  ;;  %v1042_v21 = vcombine.high %v788_v20, %v2438_v35  ;;  %v1049_v22 = vrot.slane %v788_v20, %v2778_v43  ;;  %v790_v23 = vpop.f32.mrb[6].mxu0  ;;  %v2141_v20 = vld [vmem:[#allocation11 + $0x68] sm:$0xff]  }
 0x2ca   : > { %1232 = vmax.xlane.f32.xlu0 %v1231_v15  ;;  %v1224_v16 = vpop.f32.mrb[10].mxu1  ;;  %v1041_v24 = vrot.slane %v1027_v19, %v2778_v43  ;;  %v791_v25 = vpop.f32.mrb[7].mxu0  ;;  %v2134_v14 = vld [vmem:[#allocation11 + $0x8] sm:$0xff]   ;;  %v2135_v15 = vld [vmem:[#allocation11 + $0x50] sm:$0xff]   ;;  %v2139_v19 = vld [vmem:[#allocation11 + $0x60] sm:$0xff]  }
 0x2cb   : > { %v1929_v17 = vpop.f32.mrb[11].mxu1  ;;  %v1056_v26 = vrot.slane %v1042_v21, %v2778_v43  ;;  %v1057_v27 = vcombine.low %v1034_v33, %v1049_v22  ;;  %v1058_v28 = vcombine.high %v1034_v33, %v1049_v22  ;;  %v2136_v16 = vld [vmem:[#allocation11 + $0x10] sm:$0xff]   ;;  %v2140_v33 = vld [vmem:[#allocation11 + $0x20] sm:$0xff]   ;;  %v2142_v21 = vld [vmem:[#allocation11 + $0x28] sm:$0xff]  }
 0x2cc   : > { %v2137_v17 = vld [vmem:[#allocation11 + $0x58] sm:$0xff]   ;;  %v2143_v22 = vld [vmem:[#allocation11 + $0x70] sm:$0xff]  }
 0x2cd   : > { %v1065_v29 = vrot.slane %v1057_v27, %v2782_v49  ;;  %v1072_v30 = vrot.slane %v1058_v28, %v2782_v49  ;;  %v1073_v31 = vcombine.low %v1041_v24, %v1056_v26  ;;  %v1074_v32 = vcombine.high %v1041_v24, %v1056_v26  ;;  %v2144_v23 = vld [vmem:[#allocation11 + $0x30] sm:$0xff]   ;;  %v2145_v24 = vld [vmem:[#allocation11 + $0x78] sm:$0xff]  }
 0x2ce   : > { %v2146_v25 = vld [vmem:[#allocation11 + $0x38] sm:$0xff]  }
 0x2cf   : > { %v1081_v34 = vrot.slane %v1073_v31, %v2782_v49  ;;  %v1088_v36 = vrot.slane %v1074_v32, %v2782_v49  ;;  %v1093_v37 = vcombine.low %v1065_v29, %v1072_v30  ;;  %v1862_v38 = vcombine.high %v1065_v29, %v1072_v30 }
 0x2d1   : > { %v1109_v39 = vcombine.low %v1081_v34, %v1088_v36  ;;  %v1863_v40 = vcombine.high %v1081_v34, %v1088_v36  ;;  %v1100_v53 = vrot.slane %v1093_v37, %v2778_v43  ;;  %v1108_v54 = vrot.slane %v1862_v38, %v2778_v43 }
 0x2d3   : > { %v1116_v55 = vrot.slane %v1109_v39, %v2778_v43  ;;  %v1124_v56 = vrot.slane %v1863_v40, %v2778_v43  ;;  %v1125_v57 = vcombine.low %v1100_v53, %v1108_v54 }
 0x2d5   : > { %v1133_v58 = vcombine.low %v1116_v55, %v1124_v56  ;;  %v1132_v59 = vrot.slane %v1125_v57, %v2782_v49 }
 0x2d7   : > { %v1140_v60 = vrot.slane %v1133_v58, %v2782_v49 }
 0x2d9   : > { %v1141_v61 = vcombine.low %v1132_v59, %v1140_v60  ;;  %v1142_v62 = vcombine.high %v1132_v59, %v1140_v60 }
 0x2db   : > { %v1252_v63 = vpack.c.bf16 %v1141_v61, %v1141_v61  ;;  %v1253_v0 = vpack.c.bf16 %v1142_v62, %v1142_v62 }
 0x2dd   : > { %v1259_v1 = vsel %vm1257_vm2, %v1252_v63, 0  ;;  %v1305_v2 = vsel %vm1257_vm2, %v1253_v0, 0 }
 0x2de   : > { %1931 = vmatpush3.bf16.msra.mxu1 %v1259_v1 }
 0x2df   : > { %1936 = vmatprep.subr.bf16.mxu1 %v2438_v35 }
 0x34f   : > { %v1230_v41 = vpop.xlane.xlu0 %1229 }
 0x350   : > { %v1234_v42 = vsub.f32 %v1181_v8, %v1230_v41 }
 0x352   : > { %v1236_v44 = vmul.f32 1.442695, %v1234_v42 }
 0x354   : > { %2147 = vpow2.f32 %v1236_v44 }
 0x357   : > { %v1233_v45 = vpop.xlane.xlu0 %1232 }
 0x358   : > { %v1235_v46 = vsub.f32 %v1221_v13, %v1233_v45  ;;  %v2133_v13 = vld [vmem:[#allocation11 + $0x48] sm:$0xff]  }
 0x359   : > { %1898 = vmatprep.subr.bf16.mxu0 %v2133_v13 }
 0x35a   : > { %v1238_v47 = vmul.f32 1.442695, %v1235_v46  ;;  %1899 = vmatpush3.bf16.msra.mxu0 %v2134_v14 }
 0x35b   : > { %1900 = vmatprep.subr.bf16.mxu0 %v2135_v15 }
 0x35c   : > { %2149 = vpow2.f32 %v1238_v47 }
 0x35e   : > { %v2148_v48 = vpop.eup %2147  ;;  %1901 = vmatpush3.bf16.msra.mxu0 %v2136_v16 }
 0x35f   : > { %v1240_v50 = vsel %vm1227_vm1, %v2148_v48, 0.0  ;;  %1902 = vmatprep.subr.bf16.mxu0 %v2137_v17 }
 0x360   : > { %1241 = vadd.xlane.f32.xlu1 %v1240_v50 }
 0x362   : > { %1903 = vmatpush3.bf16.msra.mxu0 %v2138_v18 }
 0x363   : > { %1904 = vmatprep.subr.bf16.mxu0 %v2139_v19 }
 0x366   : > { %v2150_v51 = vpop.eup %2149  ;;  %1905 = vmatpush3.bf16.msra.mxu0 %v2140_v33 }
 0x367   : > { %v1243_v52 = vsel %vm1227_vm1, %v2150_v51, 0.0  ;;  %1906 = vmatprep.subr.bf16.mxu0 %v2141_v20 }
 0x368   : > { %1244 = vadd.xlane.f32.xlu1 %v1243_v52 }
 0x36a   : > { %1907 = vmatpush3.bf16.msra.mxu0 %v2142_v21 }
 0x36b   : > { %1908 = vmatprep.subr.bf16.mxu0 %v2143_v22 }
 0x36e   : > { %1909 = vmatpush3.bf16.msra.mxu0 %v2144_v23 }
 0x36f   : > { %1910 = vmatprep.subr.bf16.mxu0 %v2145_v24 }
 0x372   : > { %1911 = vmatpush3.bf16.msra.mxu0 %v2146_v25 }
 0x3ed   : > { %v1242_v5 = vpop.xlane.xlu1 %1241 }
 0x3ee   : > { %2151 = vrcp.f32 %v1242_v5 }
 0x3f5   : > { %v1245_v6 = vpop.xlane.xlu1 %1244 }
 0x3f6   : > { %2153 = vrcp.f32 %v1245_v6 }
 0x3f8   : > { %v2152_v7 = vpop.eup %2151 }
 0x3f9   : > { %v1248_v8 = vmul.f32 %v2152_v7, %v2148_v48 }
 0x3fb   : > { %v1250_v9 = vpack.c.bf16 %v1248_v8, %v1248_v8 }
 0x3fd   : > { %1933 = vmatmul.mubr.msk.bf16.vlgmr.msra.gmra.mrb[12].mxu1 %vm1227_vm1, %v1250_v9 }
 0x3fe   : > { %1937 = vmatpush3.bf16.msra.mxu1 %v1305_v2  ;;  %1938 = vmatprep.mubr.msk.bf16.mxu1 %vm2439_vm0, %v2438_v35 }
 0x400   : > { %v2154_v10 = vpop.eup %2153 }
 0x401   : > { %v1249_v11 = vmul.f32 %v2154_v10, %v2150_v51 }
 0x403   : > { %v1251_v12 = vpack.c.bf16 %v1249_v11, %v1249_v11 }
 0x405   : > { %1939 = vmatmul.mubr.msk.bf16.vlgmr.msra.gmra.mrb[16].mxu1 %vm1227_vm1, %v1251_v12 }
 0x4d0   : > { %v1295_v26 = vpop.f32.mrb[12].mxu1 }
 0x4d1   : > { %v1934_v27 = vpop.f32.mrb[13].mxu1  ;;  %v1347_v30 = vcombine.high %v1295_v26, %v2438_v35  ;;  %v1354_v32 = vrot.slane %v1295_v26, %v2778_v43 }
 0x4d2   : > { %v1298_v28 = vpop.f32.mrb[14].mxu1 }
 0x4d3   : > { %v1935_v29 = vpop.f32.mrb[15].mxu1  ;;  %v1361_v39 = vrot.slane %v1347_v30, %v2778_v43 }
 0x4d8   : > { %v1341_v31 = vpop.f32.mrb[16].mxu1 }
 0x4d9   : > { %v1362_v34 = vcombine.high %v1341_v31, %v2438_v35  ;;  %v1369_v36 = vrot.slane %v1341_v31, %v2778_v43  ;;  %v1940_v37 = vpop.f32.mrb[17].mxu1 }
 0x4da   : > { %v1344_v38 = vpop.f32.mrb[18].mxu1 }
 0x4db   : > { %v1376_v40 = vrot.slane %v1362_v34, %v2778_v43  ;;  %v1377_v41 = vcombine.low %v1354_v32, %v1369_v36  ;;  %v1378_v42 = vcombine.high %v1354_v32, %v1369_v36  ;;  %v1941_v44 = vpop.f32.mrb[19].mxu1 }
 0x4dd   : > { %v1385_v45 = vrot.slane %v1377_v41, %v2782_v49  ;;  %v1392_v46 = vrot.slane %v1378_v42, %v2782_v49  ;;  %v1393_v47 = vcombine.low %v1361_v39, %v1376_v40  ;;  %v1394_v48 = vcombine.high %v1361_v39, %v1376_v40 }
 0x4df   : > { %v1401_v50 = vrot.slane %v1393_v47, %v2782_v49  ;;  %v1408_v35 = vrot.slane %v1394_v48, %v2782_v49  ;;  %v1413_v51 = vcombine.low %v1385_v45, %v1392_v46  ;;  %v1866_v52 = vcombine.high %v1385_v45, %v1392_v46 }
 0x4e1   : > { %v1420_v53 = vrot.slane %v1413_v51, %v2778_v43  ;;  %v1428_v54 = vrot.slane %v1866_v52, %v2778_v43  ;;  %v1429_v55 = vcombine.low %v1401_v50, %v1408_v35  ;;  %v1867_v56 = vcombine.high %v1401_v50, %v1408_v35 }
 0x4e3   : > { %v1436_v57 = vrot.slane %v1429_v55, %v2778_v43  ;;  %v1444_v58 = vrot.slane %v1867_v56, %v2778_v43  ;;  %v1445_v59 = vcombine.low %v1420_v53, %v1428_v54 }
 0x4e5   : > { %v1453_v60 = vcombine.low %v1436_v57, %v1444_v58  ;;  %v1452_v61 = vrot.slane %v1445_v59, %v2782_v49 }
 0x4e7   : > { %v1460_v62 = vrot.slane %v1453_v60, %v2782_v49 }
 0x4e9   : > { %v1462_v63 = vcombine.high %v1452_v61, %v1460_v62  ;;  %v1461_v0 = vcombine.low %v1452_v61, %v1460_v62 }
 0x4eb   : > { %v1464_v1 = vpack.c.bf16 %v1462_v63, %v1462_v63  ;;  %v1463_v2 = vpack.c.bf16 %v1461_v0, %v1461_v0 }
 0x4ed   : > { %1625 = vmatprep.mubr.bf16.mxu0 %v1464_v1 }
 0x4ee   : > { %1626 = vmatmul.mubr.bf16.vlgmr.msra.gmra.mrb[8].mxu0 %v1463_v2 }
 0x5c1   : > { %v1912_v3 = vpop.f32.mrb[8].mxu0 }
 0x5c2   : > { %v1913_v43 = vpop.f32.mrb[9].mxu0 }
 0x5c3   : > { %v1914_v4 = vadd.f32 %v1913_v43, %v1912_v3  ;;  %v1915_v5 = vpop.f32.mrb[10].mxu0 }
 0x5c4   : > { %v1916_v49 = vpop.f32.mrb[11].mxu0 }
 0x5c5   : > { %1633 = vst [vmem:[%s378_s12] sm:$0xff] %v1914_v4 }
 0x5c6   : > { %2340 = shalt.err (!%p2337_p2)
}
 0x5c7   : > { %s2341_s10 = scalar_lea.hbm %s2867_s7, 128  ;;  %s2345_s15 = scalar_lea.hbm %s2922_s6, 256 }
 0x5c8   : > { %p2342_p10 = scmp.ne.s32.totalorder %s2867_s7, %s2341_s10  ;;  %p2346_p8 = scmp.lt.u32.totalorder %s2867_s7, %s2922_s6 }
 0x5c9   : > { %p2347_p3 = scmp.lt.u32.totalorder %s2345_s15, %s2341_s10  ;;  %p2349_p6 = scmp.lt.u32.totalorder %s2341_s10, %s2867_s7 }
 0x5ca   : > { %p2343_p1 = pnand %p2342_p10, %p2954_p13 }
 0x5cb   : > { %p2348_p12 = por %p2347_p3, %p2346_p8 }
 0x5cc   : > { %p2344_p5 = pneg %p2343_p1 }
 0x5cd   : > { %p2350_p4 = por %p2349_p6, %p2348_p12 }
 0x5cf   : > { %p2351_p9 = pnand %p2350_p4, %p2344_p5 }
 0x5d1   : > { %2354 = shalt.err (!%p2351_p9)
}
 0x5d2   : > { %1962 = dma.vmem_to_hbm [thread:$0]  (%p2954_p13), %s2869_s29, 128, %s2867_s7, %s1635_s5  }
 0x5d3 PF: > { %s1661_s28 = sand.u32 1, %s2405_s21   ;;  %p2955_p0 = scmp.ne.s32.totalorder %s2944_s19, 0 }
 0x5d4   : > { %p2956_p7 = scmp.ge.s32.totalorder %s2425_s26, 2  ;;  %s1662_s17 = scalar_lea.sflag [#allocation4], %s1661_s28 }
 0x5d6   : > { %p1985_p11 = pnand %p2956_p7, %p2955_p0 }
 0x5d8   : > { %2400 = dma.done.wait (!%p1985_p11), %s1662_s17, 128  }
 0x5d9   : > { %2402 = vsyncadd (!%p1985_p11), %s1662_s17, 4294967168  ;;  %s27_s26 = sadd.s32 1, %s2425_s26   ;;  %s2957_s16 = sld [smem:[#allocation20_spill]] }
 0x5da   : > { %p24_p2 = scmp.ge.s32.totalorder %s27_s26, 4   ;;  %s2958_s21 = smov %s2409_s22 }
 0x5db   : > { %s2959_s22 = smov %s2413_s23  ;;  %s2960_s23 = smov %s2659_s18 }
 0x5dc   : > { %s2961_s24 = smov %s2421_s25  ;;  %26 = sbr.rel (!%p24_p2) target bundleno = 15 (0xf), region = 118 }
 0x5df   : > { %s2962_s25 = smov %s2957_s16 }
 0x5e3   :  { %1667 = vsyncpa [#allocation3], 1 }
 0x5e4   :  { %1669 = vsyncpa [#allocation3 + $0x1], 1 }
 0x5e5   :  { %1670 = vsyncpa [#allocation6], 1 }
 0x5e6   :  { %1672 = vsyncpa [#allocation6 + $0x1], 1 }
 0x5e7   :  { %1673 = vsyncpa [#allocation9], 1 }
 0x5e8   :  { %1674 = vsyncpa [#allocation12], 1 }
 0x5e9   :  { %1675 = vsyncpa [#allocation4], 1 }
 0x5ea   :  { %1677 = vsyncpa [#allocation4 + $0x1], 1 }

</bundles_post_ra>
